<compile_context>
chip_gen: v5e
topology: v5e:2x2
jax: 0.10.0
libtpu: 0.0.40
codegen_flags: <defaults>
</compile_context>

<pallas_src>
import jax
import jax.numpy as jnp
from jax.experimental import pallas as pl
from jax.experimental.pallas import tpu as pltpu


def _round_up(n, m):
    return ((n + m - 1) // m) * m


def critic_kernel(x_ref, w1_ref, b1_ref, w2_ref, b2_ref, w3_ref, b3_ref, o_ref):
    cdt = w1_ref.dtype           # MXU input dtype (f32 or bf16); accumulation is f32
    x = x_ref[...].astype(cdt)   # in-kernel cast: x stays f32 in HBM, no wrapper cast op

    # Layer 1 (MXU) + bias + ReLU, f32 accumulation / f32 epilogue.
    h1 = jnp.dot(x, w1_ref[...], preferred_element_type=jnp.float32)
    h1 = jnp.maximum(h1 + b1_ref[...], 0.0)

    # Layer 2 (MXU) + bias + ReLU.
    h2 = jnp.dot(h1.astype(cdt), w2_ref[...], preferred_element_type=jnp.float32)
    h2 = jnp.maximum(h2 + b2_ref[...], 0.0)

    # Layer 3 (out_dim == 1): contract the (1, hidden_2) w3 row against h2's last
    # dim -> result is a lane-dense (1, tb) row (full-lane vst instead of masked
    # (tb, 1) partial stores).  The scalar bias b3 lives in SMEM.
    w3 = w3_ref[...].astype(jnp.float32)
    v = jax.lax.dot_general(
        w3, h2,
        dimension_numbers=(((1,), (1,)), ((), ())),
        preferred_element_type=jnp.float32)
    o_ref[...] = (v + b3_ref[0, 0]).astype(o_ref.dtype)


def critic_forward(x, params, *, block_b=1024):
    """x: (B, obs_dim).  params: dict of w1,b1,w2,b2,w3,b3 (weights stored (in, out))."""
    B, obs_dim = x.shape
    w1, b1 = params["w1"], params["b1"]
    w2, b2 = params["w2"], params["b2"]
    w3, b3 = params["w3"], params["b3"]
    hidden_1 = w1.shape[1]
    hidden_2 = w2.shape[1]
    # Present w3 (hidden_2, 1) as a (1, hidden_2) row; tiny reshape.
    w3_row = w3.reshape(1, hidden_2).astype(jnp.float32)

    # Batch tile: as large as block_b allows (per-step overhead / tiny DMAs
    # dominate small tiles), but capped so num_blocks >= 2 whenever B permits
    # (v7x has two TensorCores; the "parallel" axis only helps with >= 2 blocks).
    # Multiple of 8 sublanes for f32 x, 16 for bf16 x.
    align = 16 if x.dtype == jnp.bfloat16 else 8
    tb = max(align, min(block_b, _round_up(pl.cdiv(B, 2), align)))
    num_blocks = pl.cdiv(B, tb)   # ragged last block handled by Pallas, no jnp.pad

    itemsize = jnp.dtype(x.dtype).itemsize
    flops = 2 * B * (obs_dim * hidden_1 + hidden_1 * hidden_2 + hidden_2)
    bytes_accessed = (
        B * obs_dim * itemsize + B * 4
        + sum(int(p.size) * jnp.dtype(p.dtype).itemsize
              for p in (w1, b1, w2, b2, w3_row, b3)))

    out = pl.pallas_call(
        critic_kernel,
        # Lane-dense output: one (1, tb) row per grid step; reshaped to (B, 1)
        # below (a B-float slice, negligible).
        out_shape=jax.ShapeDtypeStruct((num_blocks, tb), jnp.float32),
        grid=(num_blocks,),
        in_specs=[
            # Activations: software-pipelined over the batch grid axis.  The
            # ragged last block may read past row B; rows are independent, so
            # garbage rows only produce garbage outputs that are sliced away.
            pl.BlockSpec((tb, obs_dim), lambda i: (i, 0)),
            # Weights / biases: constant index maps -> stay VMEM-resident.
            pl.BlockSpec(w1.shape, lambda i: (0, 0)),
            pl.BlockSpec(b1.shape, lambda i: (0, 0)),
            pl.BlockSpec(w2.shape, lambda i: (0, 0)),
            pl.BlockSpec(b2.shape, lambda i: (0, 0)),
            pl.BlockSpec(w3_row.shape, lambda i: (0, 0)),
            # Scalar last-layer bias lives in SMEM.
            pl.BlockSpec(memory_space=pltpu.MemorySpace.SMEM),
        ],
        out_specs=pl.BlockSpec((1, tb), lambda i: (i, 0)),
        compiler_params=pltpu.CompilerParams(
            dimension_semantics=("parallel",)),
        cost_estimate=pl.CostEstimate(
            flops=flops, transcendentals=0, bytes_accessed=bytes_accessed),
    )(x, w1, b1, w2, b2, w3_row, b3)

    return out.reshape(-1)[:B].reshape(B, 1)


def cast_matmul_params_bf16(params):
    """Store bf16 copies of the matmul weights ONCE (not per call).  x stays f32
    in HBM (kernel casts it in VMEM); accumulation and epilogues remain f32."""
    p = dict(params)
    p["w1"] = params["w1"].astype(jnp.bfloat16)
    p["w2"] = params["w2"].astype(jnp.bfloat16)
    return p


def init_critic_params(key, obs_dim, hidden_1=128, hidden_2=128):
    """Deterministic init mimicking PyTorch's default Linear init
    (uniform in [-1/sqrt(fan_in), 1/sqrt(fan_in)]); weights stored (in, out)."""
    ks = jax.random.split(key, 6)

    def uniform(k, shape, fan_in):
        bound = 1.0 / jnp.sqrt(jnp.float32(fan_in))
        return jax.random.uniform(k, shape, jnp.float32, -bound, bound)

    return {
        "w1": uniform(ks[0], (obs_dim, hidden_1), obs_dim),
        "b1": uniform(ks[1], (1, hidden_1), obs_dim),
        "w2": uniform(ks[2], (hidden_1, hidden_2), hidden_1),
        "b2": uniform(ks[3], (1, hidden_2), hidden_1),
        "w3": uniform(ks[4], (hidden_2, 1), hidden_2),
        "b3": uniform(ks[5], (1, 1), hidden_2),
    }


def critic_ref(x, params):
    """Plain-JAX reference for correctness check."""
    h1 = jnp.maximum(x @ params["w1"] + params["b1"], 0.0)
    h2 = jnp.maximum(h1 @ params["w2"] + params["b2"], 0.0)
    return h2 @ params["w3"] + params["b3"]


if __name__ == "__main__":
    key = jax.random.PRNGKey(0)
    k_param, k1, k2, k3 = jax.random.split(key, 4)

    obs_dim, hidden_1, hidden_2 = 32, 128, 128
    params = init_critic_params(k_param, obs_dim, hidden_1, hidden_2)

    # Small batch (single grid step).
    x_small = jax.random.normal(k1, (8, obs_dim), jnp.float32)
    v_small = jax.block_until_ready(critic_forward(x_small, params))
    assert v_small.shape == (8, 1)
    assert jnp.allclose(v_small, critic_ref(x_small, params), atol=1e-4, rtol=1e-4), \
        "f32 mismatch (B=8)"

    # Ragged batch: B=300 -> tb=152, 2 grid steps, ragged last block (no-pad path).
    x_rag = jax.random.normal(k2, (300, obs_dim), jnp.float32)
    v_rag = jax.block_until_ready(critic_forward(x_rag, params))
    assert v_rag.shape == (300, 1)
    assert jnp.allclose(v_rag, critic_ref(x_rag, params), atol=1e-4, rtol=1e-4), \
        "f32 mismatch (B=300, ragged)"

    # Larger batch exercising the pipelined batch grid (2 blocks of 256 rows).
    x_big = jax.random.normal(k3, (512, obs_dim), jnp.float32)
    v_big = jax.block_until_ready(critic_forward(x_big, params))
    assert v_big.shape == (512, 1)
    assert jnp.allclose(v_big, critic_ref(x_big, params), atol=1e-4, rtol=1e-4), \
        "f32 mismatch (B=512)"

    # bf16 matmul-input path: weights cast once up-front, x cast in-kernel.
    params_bf16 = cast_matmul_params_bf16(params)
    v_bf16 = jax.block_until_ready(critic_forward(x_big, params_bf16))
    assert v_bf16.shape == (512, 1)
    assert jnp.allclose(v_bf16, critic_ref(x_big, params), atol=1e-1, rtol=1e-1), \
        "bf16 mismatch"

    print("KERNEL_OK")
</pallas_src>

<mosaic_0001>
module attributes {stable_mosaic.version = 11 : i64} {
  func.func @critic_kernel(%arg0: i32, %arg1: memref<8x32xf32, #tpu.memory_space<vmem>>, %arg2: memref<32x128xf32, #tpu.memory_space<vmem>>, %arg3: memref<1x128xf32, #tpu.memory_space<vmem>>, %arg4: memref<128x128xf32, #tpu.memory_space<vmem>>, %arg5: memref<1x128xf32, #tpu.memory_space<vmem>>, %arg6: memref<1x128xf32, #tpu.memory_space<vmem>>, %arg7: memref<1x1xf32, #tpu.memory_space<smem>>, %arg8: memref<1x8xf32, #tpu.memory_space<vmem>>) attributes {dimension_semantics = [#tpu.dimension_semantics<parallel>], iteration_bounds = array<i64: 1>, scalar_prefetch = 0 : i64, scratch_operands = 0 : i64, tpu.core_type = #tpu.core_type<tc>, window_params = [{transform_indices = @transform_0, window_bounds = array<i64: 8, 32>}, {pipeline_mode = #tpu.pipeline_mode<synchronous>, transform_indices = @transform_1, window_bounds = array<i64: 32, 128>}, {pipeline_mode = #tpu.pipeline_mode<synchronous>, transform_indices = @transform_2, window_bounds = array<i64: 1, 128>}, {pipeline_mode = #tpu.pipeline_mode<synchronous>, transform_indices = @transform_3, window_bounds = array<i64: 128, 128>}, {pipeline_mode = #tpu.pipeline_mode<synchronous>, transform_indices = @transform_4, window_bounds = array<i64: 1, 128>}, {pipeline_mode = #tpu.pipeline_mode<synchronous>, transform_indices = @transform_5, window_bounds = array<i64: 1, 128>}, {transform_indices = @transform_6, window_bounds = array<i64: 1, 1>}, {transform_indices = @transform_7, window_bounds = array<i64: 1, 8>}]} {
    %c0 = arith.constant 0 : index
    %c0_0 = arith.constant 0 : index
    %0 = vector.load %arg1[%c0, %c0_0] : memref<8x32xf32, #tpu.memory_space<vmem>>, vector<8x32xf32>
    %c0_1 = arith.constant 0 : index
    %c0_2 = arith.constant 0 : index
    %1 = vector.load %arg2[%c0_1, %c0_2] : memref<32x128xf32, #tpu.memory_space<vmem>>, vector<32x128xf32>
    %cst = arith.constant dense<0.000000e+00> : vector<8x128xf32>
    %2 = tpu.matmul %0, %1, %cst {dimension_numbers = #tpu.dot_dimension_numbers<[1], [0], [0], [1], [0, 0, 1, 1], [], []>} : vector<8x32xf32>, vector<32x128xf32>, vector<8x128xf32> -> vector<8x128xf32>
    %c0_3 = arith.constant 0 : index
    %c0_4 = arith.constant 0 : index
    %3 = vector.load %arg3[%c0_3, %c0_4] : memref<1x128xf32, #tpu.memory_space<vmem>>, vector<1x128xf32>
    %4 = vector.broadcast %3 : vector<1x128xf32> to vector<8x128xf32>
    %5 = arith.addf %2, %4 : vector<8x128xf32>
    %cst_5 = arith.constant 0.000000e+00 : f32
    %6 = vector.broadcast %cst_5 : f32 to vector<8x128xf32>
    %7 = arith.maximumf %5, %6 : vector<8x128xf32>
    %c0_6 = arith.constant 0 : index
    %c0_7 = arith.constant 0 : index
    %8 = vector.load %arg4[%c0_6, %c0_7] : memref<128x128xf32, #tpu.memory_space<vmem>>, vector<128x128xf32>
    %cst_8 = arith.constant dense<0.000000e+00> : vector<8x128xf32>
    %9 = tpu.matmul %7, %8, %cst_8 {dimension_numbers = #tpu.dot_dimension_numbers<[1], [0], [0], [1], [0, 0, 1, 1], [], []>} : vector<8x128xf32>, vector<128x128xf32>, vector<8x128xf32> -> vector<8x128xf32>
    %c0_9 = arith.constant 0 : index
    %c0_10 = arith.constant 0 : index
    %10 = vector.load %arg5[%c0_9, %c0_10] : memref<1x128xf32, #tpu.memory_space<vmem>>, vector<1x128xf32>
    %11 = vector.broadcast %10 : vector<1x128xf32> to vector<8x128xf32>
    %12 = arith.addf %9, %11 : vector<8x128xf32>
    %cst_11 = arith.constant 0.000000e+00 : f32
    %13 = vector.broadcast %cst_11 : f32 to vector<8x128xf32>
    %14 = arith.maximumf %12, %13 : vector<8x128xf32>
    %c0_12 = arith.constant 0 : index
    %c0_13 = arith.constant 0 : index
    %15 = vector.load %arg6[%c0_12, %c0_13] : memref<1x128xf32, #tpu.memory_space<vmem>>, vector<1x128xf32>
    %cst_14 = arith.constant dense<0.000000e+00> : vector<1x8xf32>
    %16 = tpu.matmul %15, %14, %cst_14 {dimension_numbers = #tpu.dot_dimension_numbers<[1], [1], [0], [0], [0, 0, 1, 0], [], []>} : vector<1x128xf32>, vector<8x128xf32>, vector<1x8xf32> -> vector<1x8xf32>
    %c0_15 = arith.constant 0 : index
    %c0_16 = arith.constant 0 : index
    %17 = memref.load %arg7[%c0_15, %c0_16] : memref<1x1xf32, #tpu.memory_space<smem>>
    %18 = vector.broadcast %17 : f32 to vector<1x8xf32>
    %19 = arith.addf %16, %18 : vector<1x8xf32>
    %c0_17 = arith.constant 0 : index
    %c0_18 = arith.constant 0 : index
    %20 = vector.load %arg8[%c0_17, %c0_18] : memref<1x8xf32, #tpu.memory_space<vmem>>, vector<1x8xf32>
    tpu.vector_store %arg8[%c0_17, %c0_18], %19 {strides = array<i32>} : memref<1x8xf32, #tpu.memory_space<vmem>>, vector<1x8xf32>,
    return
  }
  func.func @transform_0(%arg0: i32) -> (i32, i32) {
    %c0_i32 = arith.constant 0 : i32
    %c0_i32_0 = arith.constant 0 : i32
    return %arg0, %c0_i32 : i32, i32
  }
  func.func @transform_1(%arg0: i32) -> (i32, i32) {
    %c0_i32 = arith.constant 0 : i32
    %c0_i32_0 = arith.constant 0 : i32
    %c0_i32_1 = arith.constant 0 : i32
    return %c0_i32, %c0_i32_0 : i32, i32
  }
  func.func @transform_2(%arg0: i32) -> (i32, i32) {
    %c0_i32 = arith.constant 0 : i32
    %c0_i32_0 = arith.constant 0 : i32
    %c0_i32_1 = arith.constant 0 : i32
    return %c0_i32, %c0_i32_0 : i32, i32
  }
  func.func @transform_3(%arg0: i32) -> (i32, i32) {
    %c0_i32 = arith.constant 0 : i32
    %c0_i32_0 = arith.constant 0 : i32
    %c0_i32_1 = arith.constant 0 : i32
    return %c0_i32, %c0_i32_0 : i32, i32
  }
  func.func @transform_4(%arg0: i32) -> (i32, i32) {
    %c0_i32 = arith.constant 0 : i32
    %c0_i32_0 = arith.constant 0 : i32
    %c0_i32_1 = arith.constant 0 : i32
    return %c0_i32, %c0_i32_0 : i32, i32
  }
  func.func @transform_5(%arg0: i32) -> (i32, i32) {
    %c0_i32 = arith.constant 0 : i32
    %c0_i32_0 = arith.constant 0 : i32
    %c0_i32_1 = arith.constant 0 : i32
    return %c0_i32, %c0_i32_0 : i32, i32
  }
  func.func @transform_6(%arg0: i32) -> (i32, i32) {
    %c0_i32 = arith.constant 0 : i32
    %c0_i32_0 = arith.constant 0 : i32
    %c0_i32_1 = arith.constant 0 : i32
    return %c0_i32, %c0_i32_0 : i32, i32
  }
  func.func @transform_7(%arg0: i32) -> (i32, i32) {
    %c0_i32 = arith.constant 0 : i32
    %c0_i32_0 = arith.constant 0 : i32
    return %arg0, %c0_i32 : i32, i32
  }
}

</mosaic_0001>

<bundles_post_ra>
// kernel: tpu_custom_call.1
= control target key start
LH: loop header
LB: loop body
LE: loop exit
PB: predicated region body
PF: predicated region fallthrough
CT: control target
= control target key end

     0   :  { %13 = vsyncpa [#allocation4], 0  ;;  %s372_s0 = inlined_call_operand.hbm [shape: f32[8,32], index: 0, kind: input, shape index: {}]   ;;  %s373_s1 = inlined_call_operand.hbm [shape: f32[32,128], index: 1, kind: input, shape index: {}]   ;;  %s374_s2 = inlined_call_operand.vmem [shape: f32[1,128], index: 2, kind: input, shape index: {}]   ;;  %s375_s3 = inlined_call_operand.hbm [shape: f32[128,128], index: 3, kind: input, shape index: {}]   ;;  %s376_s4 = inlined_call_operand.vmem [shape: f32[1,128], index: 4, kind: input, shape index: {}]   ;;  %s377_s5 = inlined_call_operand.vmem [shape: f32[1,128], index: 5, kind: input, shape index: {}]   ;;  %s378_s6 = inlined_call_operand.<no memory space> [shape: f32[1,1], index: 6, kind: input, shape index: {}]   ;;  %s379_s7 = inlined_call_operand.hbm [shape: f32[1,8], index: 7, kind: output, shape index: {}]  }
   0x1   :  { %14 = vsyncpa [#allocation7], 0  ;;  %s31_s26 = sshll.u32 %s373_s1, 4  ;;  %s32_s26 = int_to_ptr.hbm [resolvable:$true] %s31_s26 }
   0x2   :  { %15 = vsyncpa [#allocation5], 0  ;;  %s302_s27 = smov [#allocation6]   ;;  %s21_s8 = sshll.u32 %s372_s0, 4  ;;  %s22_s8 = int_to_ptr.hbm [resolvable:$true] %s21_s8 }
   0x3   :  { %s33_s28 = sshll.u32 %s302_s27, 4  ;;  %s303_s9 = smov 128   ;;  %s34_s28 = int_to_ptr.vmem [resolvable:$true] %s33_s28 }
   0x4   :  { %s304_s10 = smov 8   ;;  %s305_s11 = smov [#allocation3]  }
   0x5   :  { %39 = dma.hbm_to_vmem [thread:$0]  %s32_s26, 512, %s34_s28, [#allocation7], %s303_s9, %s303_s9, %s304_s10  }
   0x6   :  { %s23_s12 = sshll.u32 %s305_s11, 4  ;;  %s46_s15 = sshll.u32 %s375_s3, 4  ;;  %s24_s12 = int_to_ptr.vmem [resolvable:$true] %s23_s12  ;;  %s47_s15 = int_to_ptr.hbm [resolvable:$true] %s46_s15 }
   0x7   :  { %26 = dma.hbm_to_vmem [thread:$0]  %s22_s8, 128, %s24_s12, [#allocation4]  }
   0x8   :  { %s306_s1 = smov [#allocation8]  }
   0x9   :  { %s48_s16 = sshll.u32 %s306_s1, 4  ;;  %s49_s16 = int_to_ptr.vmem [resolvable:$true] %s48_s16 }
   0xa   :  { %54 = dma.hbm_to_vmem [thread:$0]  %s47_s15, 2048, %s49_s16, [#allocation7], %s303_s9, %s303_s9, %s304_s10  }
   0xb   :  { %296 = dma.done.wait [#allocation4], 128  }
   0xc   :  { %297 = vsyncadd [#allocation4], 4294967168 }
   0xd   :  { %298 = dma.done.wait [#allocation7], 2560  }
   0xe   :  { %299 = vsyncadd [#allocation7], 4294964736  ;;  %v77_v0 = vld [vmem:[#allocation6 + $0x18] sm:$0xff]  ;;  %v76_v1 = vld [vmem:[#allocation6 + $0x10] sm:$0xff]  ;;  %vm82_vm0 = vcmask 261120   ;;  %v150_v30 = vstv %s378_s6  ;;  %s180_s26 = sshll.u32 %s379_s7, 4  ;;  %s181_s26 = int_to_ptr.hbm [resolvable:$true] %s180_s26 }
   0xf   :  { %98 = vmatpush.msra.mxu0 %v77_v0  ;;  %v122_v2 = vld [vmem:[#allocation8 + $0x78] sm:$0xff]  ;;  %v75_v3 = vld [vmem:[#allocation6 + $0x8] sm:$0xff]  ;;  %v121_v4 = vld [vmem:[#allocation8 + $0x70] sm:$0xff]  ;;  %vm171_vm1 = vcmask 57344  }
  0x10   :  { %127 = vmatpush.msra.mxu1 %v122_v2  ;;  %v120_v5 = vld [vmem:[#allocation8 + $0x68] sm:$0xff]  ;;  %v74_v6 = vld [vmem:[#allocation6] sm:$0xff]  ;;  %v73_v7 = vld [vmem:[#allocation3] sm:$0xff] }
  0x11   :  { %99 = vmatpush.msra.mxu0 %v76_v1  ;;  %v119_v8 = vld [vmem:[#allocation8 + $0x60] sm:$0xff]  ;;  %v118_v9 = vld [vmem:[#allocation8 + $0x58] sm:$0xff]  ;;  %v117_v10 = vld [vmem:[#allocation8 + $0x50] sm:$0xff] }
  0x12   :  { %128 = vmatpush.msra.mxu1 %v121_v4  ;;  %v116_v11 = vld [vmem:[#allocation8 + $0x48] sm:$0xff]  ;;  %v115_v12 = vld [vmem:[#allocation8 + $0x40] sm:$0xff]  ;;  %v114_v13 = vld [vmem:[#allocation8 + $0x38] sm:$0xff] }
  0x13   :  { %100 = vmatpush.msra.mxu0 %v75_v3  ;;  %v113_v14 = vld [vmem:[#allocation8 + $0x30] sm:$0xff]  ;;  %v112_v15 = vld [vmem:[#allocation8 + $0x28] sm:$0xff]  ;;  %v111_v16 = vld [vmem:[#allocation8 + $0x20] sm:$0xff] }
  0x14   :  { %129 = vmatpush.msra.mxu1 %v120_v5  ;;  %v110_v17 = vld [vmem:[#allocation8 + $0x18] sm:$0xff]  ;;  %v109_v18 = vld [vmem:[#allocation8 + $0x10] sm:$0xff]  ;;  %v108_v19 = vld [vmem:[#allocation8 + $0x8] sm:$0xff] }
  0x15   :  { %101 = vmatpush.msra.mxu0 %v74_v6  ;;  %v107_v20 = vld [vmem:[#allocation8] sm:$0xff]  ;;  %v198_v21 = vld [vmem:[%s374_s2] ss:$0 sm:$0xff]  ;;  %s307_s2 = smov [#allocation9]  }
  0x16   :  { %191 = vmatmul.msk.f32.vlgmr.msra.gmra.mxu0 %vm82_vm0, %v73_v7  ;;  %130 = vmatpush.msra.mxu1 %v119_v8  ;;  %v199_v25 = vld [vmem:[%s376_s4] ss:$0 sm:$0xff]  ;;  %s178_s23 = sshll.u32 %s307_s2, 4  ;;  %s179_s23 = int_to_ptr.vmem [resolvable:$true] %s178_s23 }
  0x17   :  { %v148_v29 = vld [vmem:[%s377_s5] sm:$0x1] }
  0x18   :  { %131 = vmatpush.msra.mxu1 %v118_v9 }
  0x1a   :  { %132 = vmatpush.msra.mxu1 %v117_v10 }
  0x1c   :  { %133 = vmatpush.msra.mxu1 %v116_v11 }
  0x1e   :  { %134 = vmatpush.msra.mxu1 %v115_v12 }
  0x20   :  { %135 = vmatpush.msra.mxu1 %v114_v13 }
  0x22   :  { %136 = vmatpush.msra.mxu1 %v113_v14 }
  0x24   :  { %137 = vmatpush.msra.mxu1 %v112_v15 }
  0x26   :  { %138 = vmatpush.msra.mxu1 %v111_v16 }
  0x28   :  { %139 = vmatpush.msra.mxu1 %v110_v17 }
  0x2a   :  { %140 = vmatpush.msra.mxu1 %v109_v18 }
  0x2c   :  { %141 = vmatpush.msra.mxu1 %v108_v19 }
  0x2e   :  { %142 = vmatpush.msra.mxu1 %v107_v20 }
  0x93   :  { %v103_v22 = vpop.f32.mrf.mxu0 }
  0x94   :  { %v104_v23 = vadd.f32 %v198_v21, %v103_v22 }
  0x96   :  { %v106_v24 = vmax.f32 %v104_v23, 0.0 }
  0x98   :  { %143 = vmatmul.f32.vlgmr.msra.gmra.mxu1 %v106_v24 }
 0x115   :  { %v144_v26 = vpop.f32.mrf.mxu1 }
 0x116   :  { %v145_v27 = vadd.f32 %v199_v25, %v144_v26 }
 0x118   :  { %v147_v28 = vmax.f32 %v145_v27, 0.0 }
 0x11a   :  { %166 = vmatpush.xpose.msra.mxu2 %v147_v28 }
 0x11d   :  { %167 = vmatmul.f32.vlgmr.msra.gmra.mxu2 %v148_v29 }
 0x1a0   :  { %v168_v31 = vpop.f32.mrf.mxu2 }
 0x1a1   :  { %v169_v32 = vadd.f32 %v168_v31, %v150_v30 }
 0x1a3   :  { %172 = vst.msk [vmem:[#allocation9] sm:$0x1] %vm171_vm1, %v169_v32 }
 0x1a4   :  { %183 = dma.vmem_to_hbm [thread:$0]  %s179_s23, 16, %s181_s26, [#allocation5]  }
 0x1a5   :  { %300 = dma.done.wait [#allocation5], 16  }
 0x1a6   :  { %301 = vsyncadd [#allocation5], 4294967280 }
 0x1a7   :  { %188 = vsyncpa [#allocation4], 1 }
 0x1a8   :  { %189 = vsyncpa [#allocation7], 1 }
 0x1a9   :  { %190 = vsyncpa [#allocation5], 1 }

</bundles_post_ra>
